<compile_context>
chip_gen: v5e
topology: v5e:2x2
jax: 0.10.0
libtpu: 0.0.40
codegen_flags: <defaults>
</compile_context>

<pallas_src>
import functools

import jax
import jax.numpy as jnp
import numpy as np
from jax.experimental import pallas as pl
from jax.experimental.pallas import tpu as pltpu

TEMPERATURE = 0.07
BASE_TEMPERATURE = 0.07


def _round_up(x, m):
    return ((x + m - 1) // m) * m


def _supcon_kernel(*refs, labels_mode, has_aux, n_rows_valid, n_cols_valid,
                   temperature, base_temperature):
    """One anchor-row tile of SupConLoss.

    labels_mode=True : refs = (row_lab[TQ,1] i32, col_lab[1,Np] i32, q[TQ,D], c[Np,D], outs...)
    labels_mode=False: refs = (mask_tile[TQ,Np] f32, q[TQ,D], c[Np,D], outs...)
    outs = (row_loss[TQ,1],) or (row_loss[TQ,1], exp_logits[TQ,Np], pos_mask[TQ,Np])
    """
    if labels_mode:
        row_lab_ref, col_lab_ref, q_ref, c_ref = refs[:4]
        out_refs = refs[4:]
        mask_tile_ref = None
    else:
        mask_tile_ref, q_ref, c_ref = refs[:3]
        out_refs = refs[3:]
        row_lab_ref = col_lab_ref = None
    loss_ref = out_refs[0]

    i = pl.program_id(0)
    tq = q_ref.shape[0]
    n_pad = c_ref.shape[0]

    # Fold 1/T into the small [TQ, D] anchor tile (not the [TQ, N] product).
    q = q_ref[...] * (1.0 / temperature)
    # 'qd,kd->qk': contract last dims of both operands -> MXU without a .T relayout.
    logits = jax.lax.dot_general(
        q, c_ref[...], (((1,), (1,)), ((), ())),
        preferred_element_type=jnp.float32)                      # [TQ, Npad] f32

    rows = jax.lax.broadcasted_iota(jnp.int32, (tq, n_pad), 0) + i * tq  # global rows
    cols = jax.lax.broadcasted_iota(jnp.int32, (tq, n_pad), 1)
    col_valid = cols < n_cols_valid                               # drop padded columns
    keep = jnp.logical_and(cols != rows, col_valid)               # drop self-contrast too
    keep_f = keep.astype(jnp.float32)

    if labels_mode:
        base = (row_lab_ref[...] == col_lab_ref[...]).astype(jnp.float32)
    else:
        base = mask_tile_ref[...]
    pos = base * keep_f                                           # positives, diag removed

    # Numerically stable softmax over the valid contrast columns only.
    row_max = jnp.max(jnp.where(col_valid, logits, jnp.float32(-1e30)),
                      axis=1, keepdims=True)
    shifted = logits - row_max
    exp_l = jnp.exp(shifted) * keep_f
    log_denom = jnp.log(jnp.sum(exp_l, axis=1, keepdims=True))    # [TQ, 1]

    # sum(pos * (shifted - log_denom)) == sum(pos*shifted) - sum(pos)*log_denom
    # (avoids materializing a full [TQ, Npad] log_prob temporary).
    pos_sum = jnp.sum(pos, axis=1, keepdims=True)
    sum_pos_shifted = jnp.sum(pos * shifted, axis=1, keepdims=True)
    # Guard rows with no positives (padding rows / n_views==1) against 0/0.
    mean_lp = (sum_pos_shifted - pos_sum * log_denom) / jnp.maximum(pos_sum, 1.0)
    per_row = (-(temperature / base_temperature)) * mean_lp       # [TQ, 1]

    row_ids = jax.lax.broadcasted_iota(jnp.int32, (tq, 1), 0) + i * tq
    loss_ref[...] = jnp.where(row_ids < n_rows_valid, per_row, 0.0)

    if has_aux:
        out_refs[1][...] = exp_l
        out_refs[2][...] = pos


def supcon_loss(features, labels=None, mask=None, *,
                temperature=TEMPERATURE, base_temperature=BASE_TEMPERATURE,
                contrast_mode='all', block_rows=128, matmul_dtype=None,
                return_aux=True):
    """JAX/Pallas SupConLoss.forward (modified=False).

    features: [bsz, n_views, ...] (L2-normalized).  Returns (loss, exp_logits, mask)
    like the torch module when return_aux=True, else just the loss scalar.
    matmul_dtype=jnp.bfloat16 enables the fast MXU path (softmax math stays f32).
    """
    if features.ndim < 3:
        raise ValueError('`features` needs to be [bsz, n_views, ...]')
    if labels is not None and mask is not None:
        raise ValueError('Cannot define both `labels` and `mask`')
    if block_rows % 128 != 0:
        raise ValueError('block_rows must be a multiple of 128')

    bsz, n_views = features.shape[0], features.shape[1]
    feats = features.reshape(bsz, n_views, -1).astype(jnp.float32)
    D = feats.shape[-1]
    N = bsz * n_views                                   # number of contrast columns

    # contrast_feature = cat(unbind(features, 1), 0)  -> view-major ordering [N, D]
    contrast = jnp.transpose(feats, (1, 0, 2)).reshape(N, D)
    if contrast_mode == 'all':
        anchor, A = contrast, N
    elif contrast_mode == 'one':
        anchor, A = contrast[:bsz], bsz                 # == features[:, 0]
    else:
        raise ValueError(f'Unknown mode: {contrast_mode}')

    labels_mode = mask is None
    if labels_mode:
        if labels is None:
            lab = jnp.arange(bsz, dtype=jnp.int32)      # eye mask == SimCLR case
        else:
            lab = jnp.asarray(labels).reshape(-1).astype(jnp.int32)
            if lab.shape[0] != bsz:
                raise ValueError('Num of labels does not match num of features')
        lab_tiled = jnp.tile(lab, n_views)              # [N]
    else:
        base_mask = jnp.asarray(mask, jnp.float32)

    # Lane-dense padding of the contrast axis; row-tile padding of the anchor axis.
    Np = _round_up(N, 128)
    tq = min(block_rows, _round_up(A, 128))
    Ap = _round_up(A, tq)
    grid = (Ap // tq,)

    contrast_p = jnp.pad(contrast, ((0, Np - N), (0, 0)))
    anchor_p = jnp.pad(anchor, ((0, Ap - A), (0, 0)))
    if matmul_dtype is not None:
        contrast_p = contrast_p.astype(matmul_dtype)
        anchor_p = anchor_p.astype(matmul_dtype)

    if labels_mode:
        col_lab = jnp.pad(lab_tiled, (0, Np - N), constant_values=-1).reshape(1, Np)
        row_lab = jnp.pad(lab_tiled[:A], (0, Ap - A), constant_values=-1).reshape(Ap, 1)
        mask_inputs = (row_lab, col_lab)
        mask_specs = [pl.BlockSpec((tq, 1), lambda i: (i, 0)),
                      pl.BlockSpec((1, Np), lambda i: (0, 0))]   # resident
    else:
        full_mask = jnp.tile(base_mask, (A // bsz, n_views))     # [A, N]
        full_mask = jnp.pad(full_mask, ((0, Ap - A), (0, Np - N)))
        mask_inputs = (full_mask,)
        mask_specs = [pl.BlockSpec((tq, Np), lambda i: (i, 0))]

    feat_specs = [pl.BlockSpec((tq, D), lambda i: (i, 0)),       # anchor row tile
                  pl.BlockSpec((Np, D), lambda i: (0, 0))]       # contrast, resident

    out_shapes = [jax.ShapeDtypeStruct((Ap, 1), jnp.float32)]
    out_specs = [pl.BlockSpec((tq, 1), lambda i: (i, 0))]
    if return_aux:
        out_shapes += [jax.ShapeDtypeStruct((Ap, Np), jnp.float32),
                       jax.ShapeDtypeStruct((Ap, Np), jnp.float32)]
        out_specs += [pl.BlockSpec((tq, Np), lambda i: (i, 0)),
                      pl.BlockSpec((tq, Np), lambda i: (i, 0))]

    kernel = functools.partial(
        _supcon_kernel,
        labels_mode=labels_mode, has_aux=return_aux,
        n_rows_valid=A, n_cols_valid=N,
        temperature=float(temperature), base_temperature=float(base_temperature))

    outs = pl.pallas_call(
        kernel,
        grid=grid,
        in_specs=list(mask_specs) + feat_specs,
        out_specs=tuple(out_specs),
        out_shape=tuple(out_shapes),
        compiler_params=pltpu.CompilerParams(
            dimension_semantics=("parallel",),
            vmem_limit_bytes=48 * 1024 * 1024),
    )(*mask_inputs, anchor_p, contrast_p)

    row_loss = outs[0]                                  # padded rows are already 0
    loss = jnp.sum(row_loss) / jnp.float32(A)           # == loss.view(anchor,bsz).mean()

    # TODO(synk): `modified=True` branch (data-dependent per-element scatter loop) is
    # not implemented; only the default modified=False path is supported.
    if not return_aux:
        return loss
    exp_logits = outs[1][:A, :N]
    pos_mask = outs[2][:A, :N]
    return loss, exp_logits, pos_mask


def _reference(features, labels=None, mask=None, temperature=TEMPERATURE,
               base_temperature=BASE_TEMPERATURE, contrast_mode='all'):
    """Pure-JAX reference mirroring the PyTorch forward (modified=False)."""
    bsz, n_views = features.shape[0], features.shape[1]
    feats = features.reshape(bsz, n_views, -1).astype(jnp.float32)
    N = bsz * n_views
    cf = jnp.transpose(feats, (1, 0, 2)).reshape(N, -1)
    if labels is None and mask is None:
        base = jnp.eye(bsz, dtype=jnp.float32)
    elif labels is not None:
        base = (labels[:, None] == labels[None, :]).astype(jnp.float32)
    else:
        base = jnp.asarray(mask, jnp.float32)
    if contrast_mode == 'one':
        anchor, acount = feats[:, 0], 1
    else:
        anchor, acount = cf, n_views
    A = acount * bsz
    m = jnp.tile(base, (acount, n_views))
    adc = (anchor @ cf.T) / temperature
    logits = adc - jnp.max(adc, axis=1, keepdims=True)
    lm = jnp.ones((A, N), jnp.float32).at[jnp.arange(A), jnp.arange(A)].set(0.0)
    m = m * lm
    el = jnp.exp(logits) * lm
    log_prob = logits - jnp.log(el.sum(1, keepdims=True))
    mlpp = (m * log_prob).sum(1) / m.sum(1)
    loss = (-(temperature / base_temperature) * mlpp).mean()
    return loss, el, m


if __name__ == "__main__":
    key = jax.random.PRNGKey(0)
    bsz, n_views, dim = 8, 2, 32
    k1, k2 = jax.random.split(key)
    feats = jax.random.normal(k1, (bsz, n_views, dim), dtype=jnp.float32)
    feats = feats / jnp.linalg.norm(feats, axis=-1, keepdims=True)   # L2-normalize
    labels = jax.random.randint(k2, (bsz,), 0, 3)

    # 1) supervised, 'all' mode, full (loss, exp_logits, mask) return
    loss, exp_logits, pos_mask = supcon_loss(feats, labels=labels)
    jax.block_until_ready((loss, exp_logits, pos_mask))
    ref_loss, ref_el, ref_m = _reference(feats, labels=labels)
    assert np.allclose(np.asarray(loss), np.asarray(ref_loss), rtol=1e-4, atol=1e-4)
    assert np.allclose(np.asarray(exp_logits), np.asarray(ref_el), rtol=1e-4, atol=1e-4)
    assert np.allclose(np.asarray(pos_mask), np.asarray(ref_m))

    # 2) loss-only fast path (no N x N writeback)
    loss_only = supcon_loss(feats, labels=labels, return_aux=False)
    assert np.allclose(np.asarray(loss_only), np.asarray(ref_loss), rtol=1e-4, atol=1e-4)

    # 3) explicit contrastive-mask path matches the in-kernel label mask path
    m_explicit = (labels[:, None] == labels[None, :]).astype(jnp.float32)
    loss_m, el_m, pm_m = supcon_loss(feats, mask=m_explicit)
    assert np.allclose(np.asarray(loss_m), np.asarray(loss), rtol=1e-5, atol=1e-5)
    assert np.allclose(np.asarray(el_m), np.asarray(exp_logits), rtol=1e-5, atol=1e-5)
    assert np.allclose(np.asarray(pm_m), np.asarray(pos_mask))

    # 4) unsupervised SimCLR path (labels=None, mask=None -> eye)
    loss_u, _, _ = supcon_loss(feats)
    ref_lu, _, _ = _reference(feats)
    assert np.allclose(np.asarray(loss_u), np.asarray(ref_lu), rtol=1e-4, atol=1e-4)

    # 5) contrast_mode='one'
    loss_o, el_o, m_o = supcon_loss(feats, labels=labels, contrast_mode='one')
    ref_lo, ref_elo, ref_mo = _reference(feats, labels=labels, contrast_mode='one')
    assert np.allclose(np.asarray(loss_o), np.asarray(ref_lo), rtol=1e-4, atol=1e-4)
    assert np.allclose(np.asarray(el_o), np.asarray(ref_elo), rtol=1e-4, atol=1e-4)

    # 6) optional bf16-MXU fast path (v6e/v7x); softmax math stays f32 -> loose check
    loss_bf16 = supcon_loss(feats, labels=labels, return_aux=False,
                            matmul_dtype=jnp.bfloat16)
    assert np.allclose(np.asarray(loss_bf16), np.asarray(ref_loss), rtol=5e-2, atol=5e-2)

    print("KERNEL_OK")
</pallas_src>

<mosaic_0001>
module attributes {stable_mosaic.version = 11 : i64} {
  func.func @_supcon_kernel(%arg0: i32, %arg1: memref<128x1xi32, #tpu.memory_space<vmem>>, %arg2: memref<1x128xi32, #tpu.memory_space<vmem>>, %arg3: memref<128x32xf32, #tpu.memory_space<vmem>>, %arg4: memref<128x32xf32, #tpu.memory_space<vmem>>, %arg5: memref<128x1xf32, #tpu.memory_space<vmem>>, %arg6: memref<128x128xf32, #tpu.memory_space<vmem>>, %arg7: memref<128x128xf32, #tpu.memory_space<vmem>>) attributes {dimension_semantics = [#tpu.dimension_semantics<parallel>], iteration_bounds = array<i64: 1>, scalar_prefetch = 0 : i64, scratch_operands = 0 : i64, tpu.core_type = #tpu.core_type<tc>, window_params = [{transform_indices = @transform_0, window_bounds = array<i64: 128, 1>}, {pipeline_mode = #tpu.pipeline_mode<synchronous>, transform_indices = @transform_1, window_bounds = array<i64: 1, 128>}, {transform_indices = @transform_2, window_bounds = array<i64: 128, 32>}, {pipeline_mode = #tpu.pipeline_mode<synchronous>, transform_indices = @transform_3, window_bounds = array<i64: 128, 32>}, {transform_indices = @transform_4, window_bounds = array<i64: 128, 1>}, {transform_indices = @transform_5, window_bounds = array<i64: 128, 128>}, {transform_indices = @transform_6, window_bounds = array<i64: 128, 128>}]} {
    %c0 = arith.constant 0 : index
    %c0_0 = arith.constant 0 : index
    %0 = vector.load %arg3[%c0, %c0_0] : memref<128x32xf32, #tpu.memory_space<vmem>>, vector<128x32xf32>
    %cst = arith.constant 14.2857141 : f32
    %1 = vector.broadcast %cst : f32 to vector<128x32xf32>
    %2 = arith.mulf %0, %1 : vector<128x32xf32>
    %c0_1 = arith.constant 0 : index
    %c0_2 = arith.constant 0 : index
    %3 = vector.load %arg4[%c0_1, %c0_2] : memref<128x32xf32, #tpu.memory_space<vmem>>, vector<128x32xf32>
    %cst_3 = arith.constant dense<0.000000e+00> : vector<128x128xf32>
    %4 = tpu.matmul %2, %3, %cst_3 {dimension_numbers = #tpu.dot_dimension_numbers<[1], [1], [0], [0], [0, 0, 1, 0], [], []>} : vector<128x32xf32>, vector<128x32xf32>, vector<128x128xf32> -> vector<128x128xf32>
    %5 = tpu.iota {dimensions = array<i32: 0>} : vector<128x128xi32>
    %c128_i32 = arith.constant 128 : i32
    %6 = arith.muli %arg0, %c128_i32 : i32
    %7 = vector.broadcast %6 : i32 to vector<128x128xi32>
    %8 = arith.addi %5, %7 : vector<128x128xi32>
    %9 = tpu.iota {dimensions = array<i32: 1>} : vector<128x128xi32>
    %c16_i32 = arith.constant 16 : i32
    %10 = vector.broadcast %c16_i32 : i32 to vector<128x128xi32>
    %11 = arith.cmpi slt, %9, %10 : vector<128x128xi32>
    %12 = arith.cmpi ne, %9, %8 : vector<128x128xi32>
    %13 = arith.andi %12, %11 : vector<128x128xi1>
    %14 = arith.extui %13 : vector<128x128xi1> to vector<128x128xi32>
    %15 = arith.sitofp %14 : vector<128x128xi32> to vector<128x128xf32>
    %c0_4 = arith.constant 0 : index
    %c0_5 = arith.constant 0 : index
    %16 = vector.load %arg1[%c0_4, %c0_5] : memref<128x1xi32, #tpu.memory_space<vmem>>, vector<128x1xi32>
    %c0_6 = arith.constant 0 : index
    %c0_7 = arith.constant 0 : index
    %17 = vector.load %arg2[%c0_6, %c0_7] : memref<1x128xi32, #tpu.memory_space<vmem>>, vector<1x128xi32>
    %18 = vector.broadcast %16 : vector<128x1xi32> to vector<128x128xi32>
    %19 = vector.broadcast %17 : vector<1x128xi32> to vector<128x128xi32>
    %20 = arith.cmpi eq, %18, %19 : vector<128x128xi32>
    %21 = arith.extui %20 : vector<128x128xi1> to vector<128x128xi32>
    %22 = arith.sitofp %21 : vector<128x128xi32> to vector<128x128xf32>
    %23 = arith.mulf %22, %15 : vector<128x128xf32>
    %cst_8 = arith.constant -1.000000e+30 : f32
    %24 = vector.broadcast %cst_8 : f32 to vector<128x128xf32>
    %25 = arith.select %11, %4, %24 : vector<128x128xi1>, vector<128x128xf32>
    %cst_9 = arith.constant dense<0xFF800000> : vector<128xf32>
    %26 = vector.multi_reduction <maximumf>, %25, %cst_9 [1] : vector<128x128xf32> to vector<128xf32>
    %27 = vector.shape_cast %26 : vector<128xf32> to vector<128x1xf32>
    %28 = vector.broadcast %27 : vector<128x1xf32> to vector<128x128xf32>
    %29 = arith.subf %4, %28 : vector<128x128xf32>
    %30 = math.exp %29 : vector<128x128xf32>
    %31 = arith.mulf %30, %15 : vector<128x128xf32>
    %cst_10 = arith.constant dense<0.000000e+00> : vector<128xf32>
    %32 = vector.multi_reduction <add>, %31, %cst_10 [1] : vector<128x128xf32> to vector<128xf32>
    %33 = vector.shape_cast %32 : vector<128xf32> to vector<128x1xf32>
    %34 = math.log %33 : vector<128x1xf32>
    %cst_11 = arith.constant dense<0.000000e+00> : vector<128xf32>
    %35 = vector.multi_reduction <add>, %23, %cst_11 [1] : vector<128x128xf32> to vector<128xf32>
    %36 = vector.shape_cast %35 : vector<128xf32> to vector<128x1xf32>
    %37 = arith.mulf %23, %29 : vector<128x128xf32>
    %cst_12 = arith.constant dense<0.000000e+00> : vector<128xf32>
    %38 = vector.multi_reduction <add>, %37, %cst_12 [1] : vector<128x128xf32> to vector<128xf32>
    %39 = vector.shape_cast %38 : vector<128xf32> to vector<128x1xf32>
    %40 = arith.mulf %36, %34 : vector<128x1xf32>
    %41 = arith.subf %39, %40 : vector<128x1xf32>
    %cst_13 = arith.constant 1.000000e+00 : f32
    %42 = vector.broadcast %cst_13 : f32 to vector<128x1xf32>
    %43 = arith.maximumf %36, %42 : vector<128x1xf32>
    %44 = arith.divf %41, %43 : vector<128x1xf32>
    %cst_14 = arith.constant -1.000000e+00 : f32
    %45 = vector.broadcast %cst_14 : f32 to vector<128x1xf32>
    %46 = arith.mulf %45, %44 : vector<128x1xf32>
    %47 = tpu.iota {dimensions = array<i32: 0>} : vector<128x1xi32>
    %c128_i32_15 = arith.constant 128 : i32
    %48 = arith.muli %arg0, %c128_i32_15 : i32
    %49 = vector.broadcast %48 : i32 to vector<128x1xi32>
    %50 = arith.addi %47, %49 : vector<128x1xi32>
    %c16_i32_16 = arith.constant 16 : i32
    %51 = vector.broadcast %c16_i32_16 : i32 to vector<128x1xi32>
    %52 = arith.cmpi slt, %50, %51 : vector<128x1xi32>
    %cst_17 = arith.constant 0.000000e+00 : f32
    %53 = vector.broadcast %cst_17 : f32 to vector<128x1xf32>
    %54 = arith.select %52, %46, %53 : vector<128x1xi1>, vector<128x1xf32>
    %c0_18 = arith.constant 0 : index
    %c0_19 = arith.constant 0 : index
    %55 = vector.load %arg5[%c0_18, %c0_19] : memref<128x1xf32, #tpu.memory_space<vmem>>, vector<128x1xf32>
    tpu.vector_store %arg5[%c0_18, %c0_19], %54 {strides = array<i32>} : memref<128x1xf32, #tpu.memory_space<vmem>>, vector<128x1xf32>,
    %c0_20 = arith.constant 0 : index
    %c0_21 = arith.constant 0 : index
    %56 = vector.load %arg6[%c0_20, %c0_21] : memref<128x128xf32, #tpu.memory_space<vmem>>, vector<128x128xf32>
    tpu.vector_store %arg6[%c0_20, %c0_21], %31 {strides = array<i32>} : memref<128x128xf32, #tpu.memory_space<vmem>>, vector<128x128xf32>,
    %c0_22 = arith.constant 0 : index
    %c0_23 = arith.constant 0 : index
    %57 = vector.load %arg7[%c0_22, %c0_23] : memref<128x128xf32, #tpu.memory_space<vmem>>, vector<128x128xf32>
    tpu.vector_store %arg7[%c0_22, %c0_23], %23 {strides = array<i32>} : memref<128x128xf32, #tpu.memory_space<vmem>>, vector<128x128xf32>,
    return
  }
  func.func @transform_0(%arg0: i32) -> (i32, i32) {
    %c0_i32 = arith.constant 0 : i32
    %c0_i32_0 = arith.constant 0 : i32
    return %arg0, %c0_i32 : i32, i32
  }
  func.func @transform_1(%arg0: i32) -> (i32, i32) {
    %c0_i32 = arith.constant 0 : i32
    %c0_i32_0 = arith.constant 0 : i32
    %c0_i32_1 = arith.constant 0 : i32
    return %c0_i32, %c0_i32_0 : i32, i32
  }
  func.func @transform_2(%arg0: i32) -> (i32, i32) {
    %c0_i32 = arith.constant 0 : i32
    %c0_i32_0 = arith.constant 0 : i32
    return %arg0, %c0_i32 : i32, i32
  }
  func.func @transform_3(%arg0: i32) -> (i32, i32) {
    %c0_i32 = arith.constant 0 : i32
    %c0_i32_0 = arith.constant 0 : i32
    %c0_i32_1 = arith.constant 0 : i32
    return %c0_i32, %c0_i32_0 : i32, i32
  }
  func.func @transform_4(%arg0: i32) -> (i32, i32) {
    %c0_i32 = arith.constant 0 : i32
    %c0_i32_0 = arith.constant 0 : i32
    return %arg0, %c0_i32 : i32, i32
  }
  func.func @transform_5(%arg0: i32) -> (i32, i32) {
    %c0_i32 = arith.constant 0 : i32
    %c0_i32_0 = arith.constant 0 : i32
    return %arg0, %c0_i32 : i32, i32
  }
  func.func @transform_6(%arg0: i32) -> (i32, i32) {
    %c0_i32 = arith.constant 0 : i32
    %c0_i32_0 = arith.constant 0 : i32
    return %arg0, %c0_i32 : i32, i32
  }
}

</mosaic_0001>

<bundles_post_ra>
// kernel: tpu_custom_call.1
= control target key start
LH: loop header
LB: loop body
LE: loop exit
PB: predicated region body
PF: predicated region fallthrough
CT: control target
= control target key end

     0   :  { %12 = vsyncpa [#allocation3], 0  ;;  %vm70_vm0 = vcmask 261120   ;;  %s2004_s0 = inlined_call_operand.vmem [shape: s32[128,1], index: 0, kind: input, shape index: {}]   ;;  %s2005_s1 = inlined_call_operand.vmem [shape: s32[1,128], index: 1, kind: input, shape index: {}]   ;;  %s2006_s2 = inlined_call_operand.vmem [shape: f32[128,32], index: 2, kind: input, shape index: {}]   ;;  %s2007_s3 = inlined_call_operand.vmem [shape: f32[128,32], index: 3, kind: input, shape index: {}]   ;;  %s2008_s4 = inlined_call_operand.vmem [shape: f32[128,1], index: 4, kind: output, shape index: {0}]   ;;  %s2009_s5 = inlined_call_operand.hbm [shape: f32[128,128], index: 5, kind: output, shape index: {1}]   ;;  %s2010_s6 = inlined_call_operand.hbm [shape: f32[128,128], index: 6, kind: output, shape index: {2}]  }
   0x1   :  { %v69_v0 = vld [vmem:[%s2007_s3 + $0x78] sm:$0xff]  ;;  %v68_v1 = vld [vmem:[%s2007_s3 + $0x70] sm:$0xff] }
   0x2   :  { %1145 = vmatpush.xpose.msk.msra.mxu0 %vm70_vm0, %v69_v0  ;;  %1210 = vmatpush.xpose.msk.msra.mxu2 %vm70_vm0, %v69_v0 }
   0x3   :  { %1211 = vmatpush.xpose.msk.msra.mxu3 %vm70_vm0, %v69_v0  ;;  %1209 = vmatpush.xpose.msk.msra.mxu1 %vm70_vm0, %v69_v0 }
   0x4   :  { %13 = vsyncpa [#allocation5], 0  ;;  %v67_v2 = vld [vmem:[%s2007_s3 + $0x68] sm:$0xff]  ;;  %v66_v3 = vld [vmem:[%s2007_s3 + $0x60] sm:$0xff]  ;;  %v1359_v6 = vmov 0   ;;  %v232_v0 = vlaneseq  ;;  %s1113_s22 = sshll.u32 %s2009_s5, 4  ;;  %s1114_s22 = int_to_ptr.hbm [resolvable:$true] %s1113_s22 }
   0x5   :  { %v65_v4 = vld [vmem:[%s2007_s3 + $0x58] sm:$0xff]  ;;  %v334_v5 = vld [vmem:[%s2004_s0] sm:$0xff]  ;;  %1263 = vset.pattern.permute.xlu0 %v1359_v6  ;;  %1264 = vset.pattern.permute.xlu1 %v1359_v6  ;;  %v64_v7 = vld [vmem:[%s2007_s3 + $0x50] sm:$0xff]  ;;  %s1362_s5 = smov 128   ;;  %s1363_s25 = smov 8  }
   0x6   :  { %1146 = vmatpush.xpose.msk.msra.mxu0 %vm70_vm0, %v68_v1  ;;  %1213 = vmatpush.xpose.msk.msra.mxu2 %vm70_vm0, %v68_v1  ;;  %v63_v8 = vld [vmem:[%s2007_s3 + $0x48] sm:$0xff]  ;;  %v62_v10 = vld [vmem:[%s2007_s3 + $0x40] sm:$0xff]  ;;  %v61_v11 = vld [vmem:[%s2007_s3 + $0x38] sm:$0xff]  ;;  %s1364_s27 = smov [#allocation4]   ;;  %s1126_s7 = sshll.u32 %s2010_s6, 4  ;;  %s1127_s7 = int_to_ptr.hbm [resolvable:$true] %s1126_s7 }
   0x7   :  { %1214 = vmatpush.xpose.msk.msra.mxu3 %vm70_vm0, %v68_v1  ;;  %1212 = vmatpush.xpose.msk.msra.mxu1 %vm70_vm0, %v68_v1  ;;  %v335_v9 = vld [vmem:[%s2004_s0 + $0x8] sm:$0xff]  ;;  %v340_v12 = vld [vmem:[%s2004_s0 + $0x30] sm:$0xff]  ;;  %v58_v17 = vld [vmem:[%s2007_s3 + $0x20] sm:$0xff]  ;;  %v1621_v1 = vand.u32 127, %v232_v0  ;;  %s1124_s28 = sshll.u32 %s1364_s27, 4  ;;  %s1125_s28 = int_to_ptr.vmem [resolvable:$true] %s1124_s28 }
   0x8   :  { %352 = vperm.xlu0 %1263, %v334_v5   ;;  %1265 = vset.pattern.permute.xlu2 %v1359_v6  ;;  %v60_v13 = vld [vmem:[%s2007_s3 + $0x30] sm:$0xff]  ;;  %v343_v14 = vld [vmem:[%s2004_s0 + $0x48] sm:$0xff]  ;;  %v57_v18 = vld [vmem:[%s2007_s3 + $0x18] sm:$0xff]  ;;  %v1360_v6 = vmov 0.0  }
   0x9   :  { %v59_v15 = vld [vmem:[%s2007_s3 + $0x28] sm:$0xff]  ;;  %v336_v16 = vld [vmem:[%s2004_s0 + $0x10] sm:$0xff]  ;;  %v337_v19 = vld [vmem:[%s2004_s0 + $0x18] sm:$0xff]  ;;  %vm269_vm1 = vcmp.lt.s32.totalorder %v1621_v1, 16 }
   0xa   :  { %1147 = vmatpush.xpose.msk.msra.mxu0 %vm70_vm0, %v67_v2  ;;  %1216 = vmatpush.xpose.msk.msra.mxu2 %vm70_vm0, %v67_v2  ;;  %v56_v20 = vld [vmem:[%s2007_s3 + $0x10] sm:$0xff]  ;;  %v55_v21 = vld [vmem:[%s2007_s3 + $0x8] sm:$0xff]  ;;  %v341_v22 = vld [vmem:[%s2004_s0 + $0x38] sm:$0xff] }
   0xb   :  { %1217 = vmatpush.xpose.msk.msra.mxu3 %vm70_vm0, %v67_v2  ;;  %1215 = vmatpush.xpose.msk.msra.mxu1 %vm70_vm0, %v67_v2  ;;  %v54_v23 = vld [vmem:[%s2007_s3] sm:$0xff]  ;;  %v344_v33 = vld [vmem:[%s2004_s0 + $0x50] sm:$0xff]  ;;  %v339_v34 = vld [vmem:[%s2004_s0 + $0x28] sm:$0xff]  ;;  %v1623_v2 = vshrl.u32 %v232_v0, 7 }
   0xc   :  { %358 = vperm.xlu1 %1264, %v336_v16   ;;  %v22_v24 = vld [vmem:[%s2006_s2] sm:$0xff]  ;;  %v31_v35 = vld [vmem:[%s2006_s2 + $0x48] sm:$0xff]  ;;  %v345_v43 = vld [vmem:[%s2004_s0 + $0x58] sm:$0xff] }
   0xd   :  { %v30_v25 = vld [vmem:[%s2006_s2 + $0x40] sm:$0xff]  ;;  %v38_v29 = vmul.f32 14.285714, %v22_v24  ;;  %v23_v36 = vld [vmem:[%s2006_s2 + $0x8] sm:$0xff]  ;;  %v47_v39 = vmul.f32 14.285714, %v31_v35  ;;  %vm270_vm2 = vcmp.ne.s32.totalorder %v1621_v1, %v1623_v2 }
   0xe   :  { %1148 = vmatpush.xpose.msk.msra.mxu0 %vm70_vm0, %v66_v3  ;;  %1219 = vmatpush.xpose.msk.msra.mxu2 %vm70_vm0, %v66_v3  ;;  %v34_v26 = vld [vmem:[%s2006_s2 + $0x60] sm:$0xff]  ;;  %v46_v30 = vmul.f32 14.285714, %v30_v25  ;;  %v35_v37 = vld [vmem:[%s2006_s2 + $0x68] sm:$0xff]  ;;  %v39_v40 = vmul.f32 14.285714, %v23_v36  ;;  %vm286_vm3 = vmand %vm270_vm2, %vm269_vm1 }
   0xf   :  { %1220 = vmatpush.xpose.msk.msra.mxu3 %vm70_vm0, %v66_v3  ;;  %1218 = vmatpush.xpose.msk.msra.mxu1 %vm70_vm0, %v66_v3  ;;  %v26_v27 = vld [vmem:[%s2006_s2 + $0x20] sm:$0xff]  ;;  %v50_v31 = vmul.f32 14.285714, %v34_v26  ;;  %v27_v38 = vld [vmem:[%s2006_s2 + $0x28] sm:$0xff]  ;;  %v51_v41 = vmul.f32 14.285714, %v35_v37 }
  0x10   :  { %355 = vperm.xlu0 %1263, %v335_v9   ;;  %v338_v28 = vld [vmem:[%s2004_s0 + $0x20] sm:$0xff]  ;;  %v42_v32 = vmul.f32 14.285714, %v26_v27  ;;  %v43_v42 = vmul.f32 14.285714, %v27_v38  ;;  %v32_v45 = vld [vmem:[%s2006_s2 + $0x50] sm:$0xff] }
  0x11   :  { %364 = vperm.xlu2 %1265, %v338_v28   ;;  %v342_v44 = vld [vmem:[%s2004_s0 + $0x40] sm:$0xff]  ;;  %v24_v46 = vld [vmem:[%s2006_s2 + $0x10] sm:$0xff]  ;;  %v48_v49 = vmul.f32 14.285714, %v32_v45  ;;  %v33_v54 = vld [vmem:[%s2006_s2 + $0x58] sm:$0xff]  ;;  %v237_v25 = vadd.s32 32, %v1623_v2 }
  0x12   :  { %1149 = vmatpush.xpose.msk.msra.mxu0 %vm70_vm0, %v65_v4  ;;  %1222 = vmatpush.xpose.msk.msra.mxu2 %vm70_vm0, %v65_v4  ;;  %v28_v47 = vld [vmem:[%s2006_s2 + $0x30] sm:$0xff]  ;;  %v40_v50 = vmul.f32 14.285714, %v24_v46  ;;  %v346_v53 = vld [vmem:[%s2004_s0 + $0x60] sm:$0xff]  ;;  %v25_v55 = vld [vmem:[%s2006_s2 + $0x18] sm:$0xff] }
  0x13   :  { %1223 = vmatpush.xpose.msk.msra.mxu3 %vm70_vm0, %v65_v4  ;;  %1221 = vmatpush.xpose.msk.msra.mxu1 %vm70_vm0, %v65_v4  ;;  %v36_v48 = vld [vmem:[%s2006_s2 + $0x70] sm:$0xff]  ;;  %v44_v51 = vmul.f32 14.285714, %v28_v47  ;;  %v29_v56 = vld [vmem:[%s2006_s2 + $0x38] sm:$0xff]  ;;  %v49_v58 = vmul.f32 14.285714, %v33_v54  ;;  %vm274_vm15 = vcmp.ne.s32.totalorder %v1621_v1, %v237_v25 }
  0x14   :  { %361 = vperm.xlu1 %1264, %v337_v19   ;;  %v52_v52 = vmul.f32 14.285714, %v36_v48  ;;  %v37_v57 = vld [vmem:[%s2006_s2 + $0x78] sm:$0xff]  ;;  %v41_v59 = vmul.f32 14.285714, %v25_v55  ;;  %v347_v62 = vld [vmem:[%s2004_s0 + $0x68] sm:$0xff] }
  0x15   :  { %v45_v60 = vmul.f32 14.285714, %v29_v56  ;;  %v53_v61 = vmul.f32 14.285714, %v37_v57  ;;  %v348_v63 = vld [vmem:[%s2004_s0 + $0x70] sm:$0xff]  ;;  %v234_v4 = vadd.s32 8, %v1623_v2 }
  0x16   :  { %1150 = vmatpush.xpose.msk.msra.mxu0 %vm70_vm0, %v64_v7  ;;  %1225 = vmatpush.xpose.msk.msra.mxu2 %vm70_vm0, %v64_v7  ;;  %v1631_v3 = vld [vmem:[%s2005_s1] ss:$0 sm:$0xff]  ;;  %v241_v47 = vadd.s32 64, %v1623_v2 }
  0x17   :  { %1226 = vmatpush.xpose.msk.msra.mxu3 %vm70_vm0, %v64_v7  ;;  %1224 = vmatpush.xpose.msk.msra.mxu1 %vm70_vm0, %v64_v7  ;;  %v1637_v7 = vsel %vm286_vm3, 1.0, %v1360_v6  ;;  %vm271_vm5 = vcmp.ne.s32.totalorder %v1621_v1, %v234_v4 }
  0x18   :  { %370 = vperm.xlu0 %1263, %v340_v12   ;;  %vm287_vm6 = vmand %vm271_vm5, %vm269_vm1 }
  0x19   :  { %367 = vperm.xlu2 %1265, %v339_v34   ;;  %v1650_v12 = vsel %vm287_vm6, 1.0, %v1360_v6  ;;  %v235_v34 = vadd.s32 16, %v1623_v2 }
  0x1a   :  { %1151 = vmatpush.xpose.msk.msra.mxu0 %vm70_vm0, %v63_v8  ;;  %1228 = vmatpush.xpose.msk.msra.mxu2 %vm70_vm0, %v63_v8 }
  0x1b   :  { %1229 = vmatpush.xpose.msk.msra.mxu3 %vm70_vm0, %v63_v8  ;;  %1227 = vmatpush.xpose.msk.msra.mxu1 %vm70_vm0, %v63_v8  ;;  %vm272_vm5 = vcmp.ne.s32.totalorder %v1621_v1, %v235_v34 }
  0x1c   :  { %373 = vperm.xlu1 %1264, %v341_v22  }
  0x1e   :  { %1152 = vmatpush.xpose.msk.msra.mxu0 %vm70_vm0, %v62_v10  ;;  %1231 = vmatpush.xpose.msk.msra.mxu2 %vm70_vm0, %v62_v10 }
  0x1f   :  { %1232 = vmatpush.xpose.msk.msra.mxu3 %vm70_vm0, %v62_v10  ;;  %1230 = vmatpush.xpose.msk.msra.mxu1 %vm70_vm0, %v62_v10  ;;  %v239_v10 = vadd.s32 48, %v1623_v2 }
  0x20   :  { %379 = vperm.xlu0 %1263, %v343_v14  }
  0x21   :  { %376 = vperm.xlu2 %1265, %v342_v44   ;;  %vm276_vm8 = vcmp.ne.s32.totalorder %v1621_v1, %v239_v10 }
  0x22   :  { %1153 = vmatpush.xpose.msk.msra.mxu0 %vm70_vm0, %v61_v11  ;;  %1234 = vmatpush.xpose.msk.msra.mxu2 %vm70_vm0, %v61_v11  ;;  %vm292_vm9 = vmand %vm276_vm8, %vm269_vm1 }
  0x23   :  { %1235 = vmatpush.xpose.msk.msra.mxu3 %vm70_vm0, %v61_v11  ;;  %1233 = vmatpush.xpose.msk.msra.mxu1 %vm70_vm0, %v61_v11 }
  0x24   :  { %382 = vperm.xlu1 %1264, %v344_v33  }
  0x26   :  { %1154 = vmatpush.xpose.msk.msra.mxu0 %vm70_vm0, %v60_v13  ;;  %1237 = vmatpush.xpose.msk.msra.mxu2 %vm70_vm0, %v60_v13 }
  0x27   :  { %1238 = vmatpush.xpose.msk.msra.mxu3 %vm70_vm0, %v60_v13  ;;  %1236 = vmatpush.xpose.msk.msra.mxu1 %vm70_vm0, %v60_v13 }
  0x2a   :  { %1155 = vmatpush.xpose.msk.msra.mxu0 %vm70_vm0, %v59_v15  ;;  %1240 = vmatpush.xpose.msk.msra.mxu2 %vm70_vm0, %v59_v15 }
  0x2b   :  { %1241 = vmatpush.xpose.msk.msra.mxu3 %vm70_vm0, %v59_v15  ;;  %1239 = vmatpush.xpose.msk.msra.mxu1 %vm70_vm0, %v59_v15  ;;  %v242_v15 = vadd.s32 72, %v1623_v2 }
  0x2c   :  { %385 = vperm.xlu1 %1264, %v345_v43  }
  0x2d   :  { %vm279_vm11 = vcmp.ne.s32.totalorder %v1621_v1, %v242_v15 }
  0x2e   :  { %1156 = vmatpush.xpose.msk.msra.mxu0 %vm70_vm0, %v58_v17  ;;  %1243 = vmatpush.xpose.msk.msra.mxu2 %vm70_vm0, %v58_v17  ;;  %vm295_vm12 = vmand %vm279_vm11, %vm269_vm1 }
  0x2f   :  { %1244 = vmatpush.xpose.msk.msra.mxu3 %vm70_vm0, %v58_v17  ;;  %1242 = vmatpush.xpose.msk.msra.mxu1 %vm70_vm0, %v58_v17  ;;  %v1665_v17 = vsel %vm292_vm9, 1.0, %v1360_v6 }
  0x32   :  { %1157 = vmatpush.xpose.msk.msra.mxu0 %vm70_vm0, %v57_v18  ;;  %1246 = vmatpush.xpose.msk.msra.mxu2 %vm70_vm0, %v57_v18 }
  0x33   :  { %1247 = vmatpush.xpose.msk.msra.mxu3 %vm70_vm0, %v57_v18  ;;  %1245 = vmatpush.xpose.msk.msra.mxu1 %vm70_vm0, %v57_v18 }
  0x34   :  { %388 = vperm.xlu1 %1264, %v346_v53  }
  0x36   :  { %1158 = vmatpush.xpose.msk.msra.mxu0 %vm70_vm0, %v56_v20  ;;  %1249 = vmatpush.xpose.msk.msra.mxu2 %vm70_vm0, %v56_v20 }
  0x37   :  { %1250 = vmatpush.xpose.msk.msra.mxu3 %vm70_vm0, %v56_v20  ;;  %1248 = vmatpush.xpose.msk.msra.mxu1 %vm70_vm0, %v56_v20 }
  0x3a   :  { %1159 = vmatpush.xpose.msk.msra.mxu0 %vm70_vm0, %v55_v21  ;;  %1252 = vmatpush.xpose.msk.msra.mxu2 %vm70_vm0, %v55_v21 }
  0x3b   :  { %1253 = vmatpush.xpose.msk.msra.mxu3 %vm70_vm0, %v55_v21  ;;  %1251 = vmatpush.xpose.msk.msra.mxu1 %vm70_vm0, %v55_v21  ;;  %v1674_v21 = vsel %vm295_vm12, 1.0, %v1360_v6 }
  0x3c   :  { %391 = vperm.xlu1 %1264, %v347_v62   ;;  %v240_v62 = vadd.s32 56, %v1623_v2 }
  0x3e   :  { %1160 = vmatpush.xpose.msk.msra.mxu0 %vm70_vm0, %v54_v23  ;;  %1255 = vmatpush.xpose.msk.msra.mxu2 %vm70_vm0, %v54_v23 }
  0x3f   :  { %1256 = vmatpush.xpose.msk.msra.mxu3 %vm70_vm0, %v54_v23  ;;  %1254 = vmatpush.xpose.msk.msra.mxu1 %vm70_vm0, %v54_v23 }
  0x41   :  { %1161 = vmatmul.msk.f32.vlgmr.msra.gmra.mxu0 %vm70_vm0, %v38_v29  ;;  %1169 = vmatmul.msk.f32.vlgmr.msra.gmra.mxu2 %vm70_vm0, %v46_v30 }
  0x42   :  { %1173 = vmatmul.msk.f32.vlgmr.msra.gmra.mxu3 %vm70_vm0, %v50_v31  ;;  %1165 = vmatmul.msk.f32.vlgmr.msra.gmra.mxu1 %vm70_vm0, %v42_v32  ;;  %v238_v32 = vadd.s32 40, %v1623_v2 }
  0x44   :  { %394 = vperm.xlu1 %1264, %v348_v63  }
  0x49   :  { %1170 = vmatmul.msk.f32.gmra.mxu2 %vm70_vm0, %v47_v39  ;;  %1162 = vmatmul.msk.f32.gmra.mxu0 %vm70_vm0, %v39_v40 }
  0x4a   :  { %1174 = vmatmul.msk.f32.gmra.mxu3 %vm70_vm0, %v51_v41  ;;  %1166 = vmatmul.msk.f32.gmra.mxu1 %vm70_vm0, %v43_v42 }
  0x51   :  { %1171 = vmatmul.msk.f32.gmra.mxu2 %vm70_vm0, %v48_v49  ;;  %1163 = vmatmul.msk.f32.gmra.mxu0 %vm70_vm0, %v40_v50  ;;  %v236_v49 = vadd.s32 24, %v1623_v2 }
  0x52   :  { %1167 = vmatmul.msk.f32.gmra.mxu1 %vm70_vm0, %v44_v51  ;;  %1175 = vmatmul.msk.f32.gmra.mxu3 %vm70_vm0, %v52_v52 }
  0x53   :  { %vm273_vm11 = vcmp.ne.s32.totalorder %v1621_v1, %v236_v49 }
  0x59   :  { %1172 = vmatmul.msk.f32.gmra.mxu2 %vm70_vm0, %v49_v58  ;;  %1164 = vmatmul.msk.f32.gmra.mxu0 %vm70_vm0, %v41_v59 }
  0x5a   :  { %1168 = vmatmul.msk.f32.gmra.mxu1 %vm70_vm0, %v45_v60  ;;  %1176 = vmatmul.msk.f32.gmra.mxu3 %vm70_vm0, %v53_v61  ;;  %vm290_vm0 = vmand %vm274_vm15, %vm269_vm1 }
  0x5b   :  { %v1686_v27 = vsel %vm290_vm0, 1.0, %v1360_v6 }
  0x6b   :  { %v365_v24 = vpop.permute.xlu2 %364 }
  0x6c   :  { %vm404_vm14 = vcmp.eq.s32.totalorder %v365_v24, %v1631_v3 }
  0x6d   :  { %v1197_v26 = vsel %vm404_vm14, 1.0, %v1360_v6  ;;  %vm277_vm14 = vcmp.ne.s32.totalorder %v1621_v1, %v240_v62 }
  0x6e   :  { %v452_v28 = vmul.f32 %v1197_v26, %v1686_v27  ;;  %vm293_vm0 = vmand %vm277_vm14, %vm269_vm1 }
  0x70   :  { %1093 = vst [vmem:[#allocation4 + $0x20] sm:$0xff] %v452_v28 }
  0x73   :  { %v368_v31 = vpop.permute.xlu2 %367 }
  0x74   :  { %vm405_vm2 = vcmp.eq.s32.totalorder %v368_v31, %v1631_v3 }
  0x75   :  { %v1198_v36 = vsel %vm405_vm2, 1.0, %v1360_v6 }
  0x7a   :  { %v353_v5 = vpop.permute.xlu0 %352 }
  0x7b   :  { %vm400_vm4 = vcmp.eq.s32.totalorder %v353_v5, %v1631_v3  ;;  %v377_v46 = vpop.permute.xlu2 %376 }
  0x7c   :  { %v1193_v8 = vsel %vm400_vm4, 1.0, %v1360_v6  ;;  %vm275_vm4 = vcmp.ne.s32.totalorder %v1621_v1, %v238_v32  ;;  %vm408_vm8 = vcmp.eq.s32.totalorder %v377_v46, %v1631_v3  ;;  %v245_v32 = vadd.s32 96, %v1623_v2 }
  0x7d   :  { %v1643_v9 = vmul.f32 %v1193_v8, %v1637_v7  ;;  %vm291_vm6 = vmand %vm275_vm4, %vm269_vm1  ;;  %v1201_v51 = vsel %vm408_vm8, 1.0, %v1360_v6  ;;  %v1772_v8 = vsel %vm293_vm0, 1.0, %v1360_v6  ;;  %v246_v46 = vadd.s32 104, %v1623_v2 }
  0x7e   :  { %v359_v33 = vpop.permute.xlu1 %358  ;;  %v1709_v39 = vsel %vm291_vm6, 1.0, %v1360_v6  ;;  %vm282_vm8 = vcmp.ne.s32.totalorder %v1621_v1, %v245_v32 }
  0x7f   :  { %1089 = vst [vmem:[#allocation4] sm:$0xff] %v1643_v9  ;;  %640 = vadd.xlane.f32.xlu1 %v1643_v9  ;;  %vm402_vm3 = vcmp.eq.s32.totalorder %v359_v33, %v1631_v3  ;;  %v453_v42 = vmul.f32 %v1198_v36, %v1709_v39 }
  0x80   :  { %v1195_v37 = vsel %vm402_vm3, 1.0, %v1360_v6 }
  0x81   :  { %1094 = vst [vmem:[#allocation4 + $0x28] sm:$0xff] %v453_v42 }
  0x82   :  { %v356_v11 = vpop.permute.xlu0 %355 }
  0x83   :  { %vm401_vm7 = vcmp.eq.s32.totalorder %v356_v11, %v1631_v3 }
  0x84   :  { %v1194_v13 = vsel %vm401_vm7, 1.0, %v1360_v6  ;;  %vm288_vm7 = vmand %vm272_vm5, %vm269_vm1 }
  0x85   :  { %v1656_v14 = vmul.f32 %v1194_v13, %v1650_v12  ;;  %v1720_v43 = vsel %vm288_vm7, 1.0, %v1360_v6 }
  0x86   :  { %v450_v45 = vmul.f32 %v1195_v37, %v1720_v43  ;;  %v362_v48 = vpop.permute.xlu1 %361 }
  0x87   :  { %1090 = vst [vmem:[#allocation4 + $0x8] sm:$0xff] %v1656_v14  ;;  %642 = vadd.xlane.f32.xlu2 %v1656_v14  ;;  %vm403_vm9 = vcmp.eq.s32.totalorder %v362_v48, %v1631_v3 }
  0x88   :  { %1091 = vst [vmem:[#allocation4 + $0x10] sm:$0xff] %v450_v45  ;;  %v1196_v52 = vsel %vm403_vm9, 1.0, %v1360_v6  ;;  %vm298_vm9 = vmand %vm282_vm8, %vm269_vm1 }
  0x89   :  { %v1189_v48 = vsel %vm298_vm9, 1.0, %v1360_v6 }
  0x8a   :  { %v371_v16 = vpop.permute.xlu0 %370 }
  0x8b   :  { %vm406_vm10 = vcmp.eq.s32.totalorder %v371_v16, %v1631_v3 }
  0x8c   :  { %v1199_v18 = vsel %vm406_vm10, 1.0, %v1360_v6  ;;  %vm278_vm10 = vcmp.ne.s32.totalorder %v1621_v1, %v241_v47 }
  0x8d   :  { %v454_v19 = vmul.f32 %v1199_v18, %v1665_v17  ;;  %vm294_vm12 = vmand %vm278_vm10, %vm269_vm1  ;;  %v243_v18 = vadd.s32 80, %v1623_v2 }
  0x8e   :  { %v1744_v55 = vsel %vm294_vm12, 1.0, %v1360_v6  ;;  %v374_v63 = vpop.permute.xlu1 %373 }
  0x8f   :  { %1095 = vst [vmem:[#allocation4 + $0x30] sm:$0xff] %v454_v19  ;;  %v456_v58 = vmul.f32 %v1201_v51, %v1744_v55  ;;  %vm407_vm15 = vcmp.eq.s32.totalorder %v374_v63, %v1631_v3  ;;  %v244_v19 = vadd.s32 88, %v1623_v2  ;;  %vm280_vm2 = vcmp.ne.s32.totalorder %v1621_v1, %v243_v18 }
  0x90   :  { %v1200_v5 = vsel %vm407_vm15, 1.0, %v1360_v6  ;;  %vm296_vm4 = vmand %vm280_vm2, %vm269_vm1 }
  0x91   :  { %1097 = vst [vmem:[#allocation4 + $0x40] sm:$0xff] %v456_v58  ;;  %v455_v13 = vmul.f32 %v1200_v5, %v1772_v8  ;;  %vm281_vm5 = vcmp.ne.s32.totalorder %v1621_v1, %v244_v19  ;;  %v1797_v24 = vsel %vm296_vm4, 1.0, %v1360_v6  ;;  %vm1056_vm4 = vcmask 7168  }
  0x92   :  { %v380_v20 = vpop.permute.xlu0 %379  ;;  %vm297_vm6 = vmand %vm281_vm5, %vm269_vm1  ;;  %1059 = vst.msk [vmem:[%s2008_s4 + $0x10] sm:$0xff] %vm1056_vm4, %v1360_v6 }
  0x93   :  { %vm409_vm13 = vcmp.eq.s32.totalorder %v380_v20, %v1631_v3  ;;  %1096 = vst [vmem:[#allocation4 + $0x38] sm:$0xff] %v455_v13  ;;  %v1809_v31 = vsel %vm297_vm6, 1.0, %v1360_v6 }
  0x94   :  { %v1202_v22 = vsel %vm409_vm13, 1.0, %v1360_v6  ;;  %vm289_vm13 = vmand %vm273_vm11, %vm269_vm1  ;;  %vm283_vm11 = vcmp.ne.s32.totalorder %v1621_v1, %v246_v46  ;;  %1060 = vst.msk [vmem:[%s2008_s4 + $0x18] sm:$0xff] %vm1056_vm4, %v1360_v6 }
  0x95   :  { %v457_v23 = vmul.f32 %v1202_v22, %v1674_v21  ;;  %v1755_v59 = vsel %vm289_vm13, 1.0, %v1360_v6  ;;  %vm299_vm12 = vmand %vm283_vm11, %vm269_vm1  ;;  %1061 = vst.msk [vmem:[%s2008_s4 + $0x20] sm:$0xff] %vm1056_vm4, %v1360_v6 }
  0x96   :  { %v451_v61 = vmul.f32 %v1196_v52, %v1755_v59  ;;  %v383_v20 = vpop.permute.xlu1 %382  ;;  %1062 = vst.msk [vmem:[%s2008_s4 + $0x28] sm:$0xff] %vm1056_vm4, %v1360_v6 }
  0x97   :  { %1098 = vst [vmem:[#allocation4 + $0x48] sm:$0xff] %v457_v23  ;;  %vm410_vm3 = vcmp.eq.s32.totalorder %v383_v20, %v1631_v3 }
  0x98   :  { %1092 = vst [vmem:[#allocation4 + $0x18] sm:$0xff] %v451_v61  ;;  %v1203_v23 = vsel %vm410_vm3, 1.0, %v1360_v6 }
  0x99   :  { %v458_v26 = vmul.f32 %v1203_v23, %v1797_v24  ;;  %1063 = vst.msk [vmem:[%s2008_s4 + $0x30] sm:$0xff] %vm1056_vm4, %v1360_v6 }
  0x9a   :  { %1064 = vst.msk [vmem:[%s2008_s4 + $0x38] sm:$0xff] %vm1056_vm4, %v1360_v6 }
  0x9b   :  { %1099 = vst [vmem:[#allocation4 + $0x50] sm:$0xff] %v458_v26 }
  0x9c   :  { %1065 = vst.msk [vmem:[%s2008_s4 + $0x40] sm:$0xff] %vm1056_vm4, %v1360_v6 }
  0x9d   :  { %1066 = vst.msk [vmem:[%s2008_s4 + $0x48] sm:$0xff] %vm1056_vm4, %v1360_v6 }
  0x9e   :  { %1067 = vst.msk [vmem:[%s2008_s4 + $0x50] sm:$0xff] %vm1056_vm4, %v1360_v6 }
  0x9f   :  { %1068 = vst.msk [vmem:[%s2008_s4 + $0x58] sm:$0xff] %vm1056_vm4, %v1360_v6 }
  0xa0   :  { %1069 = vst.msk [vmem:[%s2008_s4 + $0x60] sm:$0xff] %vm1056_vm4, %v1360_v6 }
  0xa1   :  { %1070 = vst.msk [vmem:[%s2008_s4 + $0x68] sm:$0xff] %vm1056_vm4, %v1360_v6 }
  0xa2   :  { %1071 = vst.msk [vmem:[%s2008_s4 + $0x70] sm:$0xff] %vm1056_vm4, %v1360_v6 }
  0xa3   :  { %1072 = vst.msk [vmem:[%s2008_s4 + $0x78] sm:$0xff] %vm1056_vm4, %v1360_v6 }
  0xbe   :  { %v1689_v29 = vpop.f32.mrf.mxu0 }
  0xbf   :  { %v464_v30 = vsel %vm269_vm1, %v1689_v29, -1e+30  ;;  %v1698_v35 = vpop.f32.mrf.mxu1 }
  0xc0   :  { %480 = vmax.xlane.f32.xlu2 %v464_v30  ;;  %v468_v41 = vsel %vm269_vm1, %v1698_v35, -1e+30  ;;  %v386_v30 = vpop.permute.xlu1 %385 }
  0xc1   :  { %vm411_vm7 = vcmp.eq.s32.totalorder %v386_v30, %v1631_v3 }
  0xc2   :  { %v1204_v36 = vsel %vm411_vm7, 1.0, %v1360_v6 }
  0xc3   :  { %v459_v37 = vmul.f32 %v1204_v36, %v1809_v31 }
  0xc4   :  { %v1706_v38 = vpop.f32.mrf.mxu2 }
  0xc5   :  { %v1713_v40 = vpop.f32.mrf.mxu3  ;;  %v472_v57 = vsel %vm269_vm1, %v1706_v38, -1e+30  ;;  %1100 = vst [vmem:[#allocation4 + $0x58] sm:$0xff] %v459_v37 }
  0xc6   :  { %v476_v44 = vsel %vm269_vm1, %v1713_v40, -1e+30  ;;  %v1728_v50 = vpop.f32.mrf.mxu0 }
  0xc7   :  { %504 = vmax.xlane.f32.xlu0 %v476_v44  ;;  %v465_v54 = vsel %vm269_vm1, %v1728_v50, -1e+30  ;;  %v1762_v0 = vpop.f32.mrf.mxu1 }
  0xc8   :  { %488 = vmax.xlane.f32.xlu2 %v468_v41  ;;  %v469_v11 = vsel %vm269_vm1, %v1762_v0, -1e+30  ;;  %v389_v45 = vpop.permute.xlu1 %388 }
  0xc9   :  { %vm412_vm10 = vcmp.eq.s32.totalorder %v389_v45, %v1631_v3 }
  0xca   :  { %v1205_v49 = vsel %vm412_vm10, 1.0, %v1360_v6 }
  0xcb   :  { %v460_v51 = vmul.f32 %v1205_v49, %v1189_v48 }
  0xcc   :  { %v1738_v53 = vpop.f32.mrf.mxu2 }
  0xcd   :  { %v1748_v56 = vpop.f32.mrf.mxu3  ;;  %v473_v25 = vsel %vm269_vm1, %v1738_v53, -1e+30  ;;  %1101 = vst [vmem:[#allocation4 + $0x60] sm:$0xff] %v460_v51 }
  0xce   :  { %v477_v60 = vsel %vm269_vm1, %v1748_v56, -1e+30  ;;  %v1766_v4 = vpop.f32.mrf.mxu0 }
  0xcf   :  { %506 = vmax.xlane.f32.xlu1 %v477_v60  ;;  %482 = vmax.xlane.f32.xlu0 %v465_v54  ;;  %v466_v16 = vsel %vm269_vm1, %v1766_v4, -1e+30  ;;  %v1790_v22 = vpop.f32.mrf.mxu1  ;;  %v247_v54 = vadd.s32 112, %v1623_v2  ;;  %v1847_v60 = vsel %vm299_vm12, 1.0, %v1360_v6 }
  0xd0   :  { %496 = vmax.xlane.f32.xlu2 %v472_v57  ;;  %v470_v28 = vsel %vm269_vm1, %v1790_v22, -1e+30  ;;  %v392_v57 = vpop.permute.xlu1 %391 }
  0xd1   :  { %vm413_vm13 = vcmp.eq.s32.totalorder %v392_v57, %v1631_v3  ;;  %vm284_vm14 = vcmp.ne.s32.totalorder %v1621_v1, %v247_v54 }
  0xd2   :  { %v1206_v61 = vsel %vm413_vm13, 1.0, %v1360_v6  ;;  %vm300_vm15 = vmand %vm284_vm14, %vm269_vm1 }
  0xd3   :  { %v461_v62 = vmul.f32 %v1206_v61, %v1847_v60 }
  0xd4   :  { %v1774_v10 = vpop.f32.mrf.mxu2 }
  0xd5   :  { %v474_v15 = vsel %vm269_vm1, %v1774_v10, -1e+30  ;;  %v1826_v44 = vpop.f32.mrf.mxu3  ;;  %1102 = vst [vmem:[#allocation4 + $0x68] sm:$0xff] %v461_v62 }
  0xd6   :  { %v1812_v33 = vpop.f32.mrf.mxu0 }
  0xd7   :  { %500 = vmax.xlane.f32.xlu1 %v474_v15  ;;  %490 = vmax.xlane.f32.xlu0 %v469_v11  ;;  %v467_v41 = vsel %vm269_vm1, %v1812_v33, -1e+30  ;;  %v1831_v47 = vpop.f32.mrf.mxu1  ;;  %v1858_v11 = vsel %vm300_vm15, 1.0, %v1360_v6 }
  0xd8   :  { %484 = vmax.xlane.f32.xlu2 %v466_v16  ;;  %v471_v52 = vsel %vm269_vm1, %v1831_v47, -1e+30  ;;  %v395_v5 = vpop.permute.xlu1 %394 }
  0xd9   :  { %vm414_vm0 = vcmp.eq.s32.totalorder %v395_v5, %v1631_v3 }
  0xda   :  { %v1207_v13 = vsel %vm414_vm0, 1.0, %v1360_v6 }
  0xdb   :  { %v462_v15 = vmul.f32 %v1207_v13, %v1858_v11 }
  0xdc   :  { %v1815_v34 = vpop.f32.mrf.mxu2 }
  0xdd   :  { %v475_v42 = vsel %vm269_vm1, %v1815_v34, -1e+30  ;;  %v1843_v58 = vpop.f32.mrf.mxu3  ;;  %1103 = vst [vmem:[#allocation4 + $0x70] sm:$0xff] %v462_v15 }
  0xde   :  { %v479_v63 = vsel %vm269_vm1, %v1843_v58, -1e+30 }
  0xdf   :  { %498 = vmax.xlane.f32.xlu0 %v473_v25 }
  0xe0   :  { %492 = vmax.xlane.f32.xlu2 %v470_v28 }
  0xe7   :  { %486 = vmax.xlane.f32.xlu0 %v467_v41 }
  0xe8   :  { %502 = vmax.xlane.f32.xlu2 %v475_v42 }
  0xef   :  { %494 = vmax.xlane.f32.xlu0 %v471_v52 }
  0xf2   :  { %v1867_v25 = vpop.xlane.xlu1 %640 }
  0xf7   :  { %510 = vmax.xlane.f32.xlu0 %v479_v63 }
  0xfa   :  { %v1863_v16 = vpop.xlane.xlu2 %642 }
 0x133   :  { %v481_v18 = vpop.xlane.xlu2 %480 }
 0x134   :  { %v512_v19 = vsub.f32 %v1689_v29, %v481_v18 }
 0x136   :  { %v528_v20 = vmul.f32 1.442695, %v512_v19  ;;  %v672_v23 = vmul.f32 %v512_v19, %v1643_v9 }
 0x138   :  { %1267 = vpow2.f32 %v528_v20  ;;  %688 = vadd.xlane.f32.xlu1 %v672_v23 }
 0x13a   :  { %v505_v26 = vpop.xlane.xlu0 %504 }
 0x13b   :  { %v524_v28 = vsub.f32 %v1713_v40, %v505_v26  ;;  %v489_v30 = vpop.xlane.xlu2 %488 }
 0x13c   :  { %v516_v32 = vsub.f32 %v1698_v35, %v489_v30 }
 0x13d   :  { %v552_v36 = vmul.f32 1.442695, %v524_v28 }
 0x13e   :  { %v1268_v37 = vpop.eup %1267  ;;  %v536_v41 = vmul.f32 1.442695, %v516_v32 }
 0x13f   :  { %1269 = vpow2.f32 %v552_v36  ;;  %v560_v42 = vmul.f32 %v1268_v37, %v1637_v7 }
 0x140   :  { %1271 = vpow2.f32 %v536_v41 }
 0x141   :  { %1073 = vst [vmem:[#allocation2] sm:$0xff] %v560_v42  ;;  %576 = vadd.xlane.f32.xlu2 %v560_v42 }
 0x142   :  { %v507_v9 = vpop.xlane.xlu1 %506  ;;  %v483_v29 = vpop.xlane.xlu0 %482 }
 0x143   :  { %v525_v45 = vsub.f32 %v1748_v56, %v507_v9  ;;  %v513_v46 = vsub.f32 %v1728_v50, %v483_v29  ;;  %v497_v49 = vpop.xlane.xlu2 %496  ;;  %v478_v56 = vsel %vm269_vm1, %v1826_v44, -1e+30 }
 0x144   :  { %v520_v40 = vsub.f32 %v1706_v38, %v497_v49 }
 0x145   :  { %v1270_v51 = vpop.eup %1269  ;;  %v554_v35 = vmul.f32 1.442695, %v525_v45  ;;  %v530_v52 = vmul.f32 1.442695, %v513_v46  ;;  %v673_v28 = vmul.f32 %v513_v46, %v1656_v14 }
 0x146   :  { %v1272_v54 = vpop.eup %1271  ;;  %v572_v57 = vmul.f32 %v1270_v51, %v1189_v48  ;;  %v544_v61 = vmul.f32 1.442695, %v520_v40 }
 0x147   :  { %v564_v7 = vmul.f32 %v1272_v54, %v1686_v27  ;;  %1273 = vpow2.f32 %v554_v35 }
 0x148   :  { %1085 = vst [vmem:[#allocation2 + $0x60] sm:$0xff] %v572_v57  ;;  %1275 = vpow2.f32 %v530_v52 }
 0x149   :  { %1077 = vst [vmem:[#allocation2 + $0x20] sm:$0xff] %v564_v7  ;;  %1277 = vpow2.f32 %v544_v61  ;;  %508 = vmax.xlane.f32.xlu2 %v478_v56 }
 0x14a   :  { %v501_v50 = vpop.xlane.xlu1 %500  ;;  %v491_v38 = vpop.xlane.xlu0 %490 }
 0x14b   :  { %v522_v62 = vsub.f32 %v1774_v10, %v501_v50  ;;  %v517_v63 = vsub.f32 %v1762_v0, %v491_v38  ;;  %v485_v48 = vpop.xlane.xlu2 %484  ;;  %v753_v50 = vmax.f32 %v1863_v16, 1.0 }
 0x14c   :  { %v514_v5 = vsub.f32 %v1766_v4, %v485_v48 }
 0x14d   :  { %v1274_v27 = vpop.eup %1273  ;;  %v548_v13 = vmul.f32 1.442695, %v522_v62  ;;  %v538_v15 = vmul.f32 1.442695, %v517_v63  ;;  %vm788_vm8 = vweird.f32 %v753_v50 }
 0x14e   :  { %v1276_v18 = vpop.eup %1275  ;;  %v573_v19 = vmul.f32 %v1274_v27, %v1847_v60  ;;  %v532_v20 = vmul.f32 1.442695, %v514_v5 }
 0x14f   :  { %v1278_v23 = vpop.eup %1277  ;;  %1279 = vpow2.f32 %v548_v13  ;;  %v561_v26 = vmul.f32 %v1276_v18, %v1650_v12 }
 0x150   :  { %1086 = vst [vmem:[#allocation2 + $0x68] sm:$0xff] %v573_v19  ;;  %v568_v10 = vmul.f32 %v1278_v23, %v1744_v55  ;;  %1281 = vpow2.f32 %v538_v15 }
 0x151   :  { %1283 = vpow2.f32 %v532_v20  ;;  %1074 = vst [vmem:[#allocation2 + $0x8] sm:$0xff] %v561_v26  ;;  %578 = vadd.xlane.f32.xlu0 %v561_v26  ;;  %690 = vadd.xlane.f32.xlu2 %v673_v28 }
 0x152   :  { %1081 = vst [vmem:[#allocation2 + $0x40] sm:$0xff] %v568_v10  ;;  %v499_v0 = vpop.xlane.xlu0 %498 }
 0x153   :  { %v521_v4 = vsub.f32 %v1738_v53, %v499_v0  ;;  %v493_v60 = vpop.xlane.xlu2 %492 }
 0x154   :  { %v518_v30 = vsub.f32 %v1790_v22, %v493_v60 }
 0x155   :  { %v1280_v32 = vpop.eup %1279  ;;  %v546_v36 = vmul.f32 1.442695, %v521_v4 }
 0x156   :  { %v1282_v12 = vpop.eup %1281  ;;  %v570_v14 = vmul.f32 %v1280_v32, %v1797_v24  ;;  %v540_v37 = vmul.f32 1.442695, %v518_v30 }
 0x157   :  { %v1284_v41 = vpop.eup %1283  ;;  %v565_v55 = vmul.f32 %v1282_v12, %v1709_v39  ;;  %1285 = vpow2.f32 %v546_v36 }
 0x158   :  { %1083 = vst [vmem:[#allocation2 + $0x50] sm:$0xff] %v570_v14  ;;  %v562_v42 = vmul.f32 %v1284_v41, %v1720_v43  ;;  %1287 = vpow2.f32 %v540_v37  ;;  %v794_v41 = vand.u32 2147483648, %v753_v50 }
 0x159   :  { %1078 = vst [vmem:[#allocation2 + $0x28] sm:$0xff] %v565_v55 }
 0x15a   :  { %1075 = vst [vmem:[#allocation2 + $0x10] sm:$0xff] %v562_v42  ;;  %v487_v53 = vpop.xlane.xlu0 %486  ;;  %v792_v42 = vand.u32 2147483647, %v753_v50 }
 0x15b   :  { %v515_v9 = vsub.f32 %v1812_v33, %v487_v53  ;;  %v503_v22 = vpop.xlane.xlu2 %502  ;;  %v349_v33 = vld [vmem:[%s2004_s0 + $0x78] sm:$0xff]  ;;  %s1361_s0 = smov [#allocation2]  }
 0x15c   :  { %v523_v29 = vsub.f32 %v1815_v34, %v503_v22  ;;  %s1111_s19 = sshll.u32 %s1361_s0, 4  ;;  %v795_v22 = vor.u32 1.1754944e-38, %v794_v41  ;;  %vm793_vm11 = vcmp.eq.f32.partialorder %v792_v42, 8.507059e+37  ;;  %s1112_s19 = int_to_ptr.vmem [resolvable:$true] %s1111_s19 }
 0x15d   :  { %v1286_v45 = vpop.eup %1285  ;;  %v534_v46 = vmul.f32 1.442695, %v515_v9 }
 0x15e   :  { %v1288_v24 = vpop.eup %1287  ;;  %v569_v49 = vmul.f32 %v1286_v45, %v1674_v21  ;;  %v550_v40 = vmul.f32 1.442695, %v523_v29 }
 0x15f   :  { %v566_v39 = vmul.f32 %v1288_v24, %v1665_v17  ;;  %1289 = vpow2.f32 %v534_v46  ;;  %v248_v17 = vadd.s32 120, %v1623_v2 }
 0x160   :  { %1082 = vst [vmem:[#allocation2 + $0x48] sm:$0xff] %v569_v49  ;;  %1291 = vpow2.f32 %v550_v40 }
 0x161   :  { %1079 = vst [vmem:[#allocation2 + $0x30] sm:$0xff] %v566_v39  ;;  %vm285_vm2 = vcmp.ne.s32.totalorder %v1621_v1, %v248_v17  ;;  %v752_v1 = vmax.f32 %v1867_v25, 1.0 }
 0x162   :  { %v495_v43 = vpop.xlane.xlu0 %494  ;;  %vm301_vm3 = vmand %vm285_vm2, %vm269_vm1 }
 0x163   :  { %v519_v51 = vsub.f32 %v1831_v47, %v495_v43  ;;  %vm773_vm1 = vweird.f32 %v752_v1  ;;  %v779_v48 = vand.u32 2147483648, %v752_v1  ;;  %v777_v13 = vand.u32 2147483647, %v752_v1 }
 0x165   :  { %v1290_v34 = vpop.eup %1289  ;;  %v542_v35 = vmul.f32 1.442695, %v519_v51  ;;  %397 = vperm.xlu0 %1263, %v349_v33   ;;  %v780_v20 = vor.u32 1.1754944e-38, %v779_v48  ;;  %vm778_vm7 = vcmp.eq.f32.partialorder %v777_v13, 8.507059e+37 }
 0x166   :  { %v1292_v52 = vpop.eup %1291  ;;  %v563_v21 = vmul.f32 %v1290_v34, %v1755_v59  ;;  %v1908_v59 = vsel %vm301_vm3, 1.0, %v1360_v6 }
 0x167   :  { %v571_v54 = vmul.f32 %v1292_v52, %v1809_v31  ;;  %1293 = vpow2.f32 %v542_v35 }
 0x168   :  { %1076 = vst [vmem:[#allocation2 + $0x18] sm:$0xff] %v563_v21 }
 0x169   :  { %1084 = vst [vmem:[#allocation2 + $0x58] sm:$0xff] %v571_v54 }
 0x16a   :  { %v511_v57 = vpop.xlane.xlu0 %510 }
 0x16b   :  { %v527_v61 = vsub.f32 %v1843_v58, %v511_v57 }
 0x16d   :  { %v1294_v7 = vpop.eup %1293  ;;  %v558_v56 = vmul.f32 1.442695, %v527_v61 }
 0x16e   :  { %v567_v47 = vmul.f32 %v1294_v7, %v1772_v8 }
 0x16f   :  { %1295 = vpow2.f32 %v558_v56 }
 0x170   :  { %1080 = vst [vmem:[#allocation2 + $0x38] sm:$0xff] %v567_v47  ;;  %1297 = vrcp.f32 %v752_v1 }
 0x171   :  { %1299 = vrcp.f32 %v753_v50 }
 0x175   :  { %v1296_v31 = vpop.eup %1295 }
 0x176   :  { %v575_v2 = vmul.f32 %v1296_v31, %v1908_v59  ;;  %v1298_v8 = vpop.eup %1297 }
 0x177   :  { %v769_v58 = vmul.f32 %v1298_v8, %v752_v1  ;;  %vm774_vm5 = vweird.f32 %v1298_v8  ;;  %v1300_v5 = vpop.eup %1299 }
 0x178   :  { %1088 = vst [vmem:[#allocation2 + $0x78] sm:$0xff] %v575_v2  ;;  %vm775_vm6 = vmor %vm773_vm1, %vm774_vm5  ;;  %v784_v26 = vmul.f32 %v1300_v5, %v753_v50  ;;  %vm789_vm9 = vweird.f32 %v1300_v5 }
 0x179   :  { %v770_v38 = vsub.f32 1.0, %v769_v58  ;;  %vm790_vm10 = vmor %vm788_vm8, %vm789_vm9 }
 0x17a   :  { %v785_v36 = vsub.f32 1.0, %v784_v26 }
 0x17b   :  { %v771_v63 = vmul.f32 %v1298_v8, %v770_v38 }
 0x17d   :  { %v772_v27 = vadd.f32 %v1298_v8, %v771_v63 }
 0x17f   :  { %v776_v28 = vsel %vm775_vm6, %v1298_v8, %v772_v27 }
 0x180   :  { %v781_v30 = vsel %vm778_vm7, %v780_v20, %v776_v28 }
 0x1ab   :  { %v689_v0 = vpop.xlane.xlu1 %688 }
 0x1b4   :  { %v577_v62 = vpop.xlane.xlu2 %576 }
 0x1b5   :  { %1301 = vlog2.f32 %v577_v62 }
 0x1bb   :  { %v1302_v15 = vpop.eup %1301 }
 0x1bc   :  { %v609_v18 = vmul.f32 0.6931472, %v1302_v15  ;;  %v509_v19 = vpop.xlane.xlu2 %508 }
 0x1bd   :  { %v526_v23 = vsub.f32 %v1826_v44, %v509_v19  ;;  %v786_v44 = vmul.f32 %v1300_v5, %v785_v36 }
 0x1be   :  { %v720_v10 = vmul.f32 %v1867_v25, %v609_v18 }
 0x1bf   :  { %v556_v4 = vmul.f32 1.442695, %v526_v23  ;;  %v787_v55 = vadd.f32 %v1300_v5, %v786_v44 }
 0x1c0   :  { %v736_v60 = vsub.f32 %v689_v0, %v720_v10 }
 0x1c1   :  { %1303 = vpow2.f32 %v556_v4  ;;  %v791_v29 = vsel %vm790_vm10, %v1300_v5, %v787_v55 }
 0x1c2   :  { %v782_v32 = vmul.f32 %v781_v30, %v736_v60 }
 0x1c4   :  { %v1008_v12 = vmul.f32 -1.0, %v782_v32  ;;  %v579_v14 = vpop.xlane.xlu0 %578  ;;  %v691_v46 = vpop.xlane.xlu2 %690 }
 0x1c5   :  { %1305 = vlog2.f32 %v579_v14 }
 0x1c6   :  { %1057 = vst.msk [vmem:[%s2008_s4] sm:$0xff] %vm1056_vm4, %v1008_v12 }
 0x1c7   :  { %v1304_v25 = vpop.eup %1303 }
 0x1c8   :  { %v574_v37 = vmul.f32 %v1304_v25, %v1858_v11  ;;  %v796_v11 = vsel %vm793_vm11, %v795_v22, %v791_v29 }
 0x1ca   :  { %1087 = vst [vmem:[#allocation2 + $0x70] sm:$0xff] %v574_v37 }
 0x1cb   :  { %v1306_v53 = vpop.eup %1305  ;;  %1119 = dma.vmem_to_hbm [thread:$0]  %s1112_s19, 2048, %s1114_s22, [#allocation3], %s1362_s5, %s1362_s5, %s1363_s25  }
 0x1cc   :  { %v611_v9 = vmul.f32 0.6931472, %v1306_v53 }
 0x1ce   :  { %v721_v45 = vmul.f32 %v1863_v16, %v611_v9 }
 0x1d0   :  { %v737_v24 = vsub.f32 %v691_v46, %v721_v45 }
 0x1d2   :  { %v797_v49 = vmul.f32 %v796_v11, %v737_v24 }
 0x1d4   :  { %v1009_v40 = vmul.f32 -1.0, %v797_v49 }
 0x1d6   :  { %1058 = vst.msk [vmem:[%s2008_s4 + $0x8] sm:$0xff] %vm1056_vm4, %v1009_v40 }
 0x1d7   :  { %v398_v39 = vpop.permute.xlu0 %397 }
 0x1d8   :  { %vm415_vm12 = vcmp.eq.s32.totalorder %v398_v39, %v1631_v3 }
 0x1d9   :  { %v1208_v16 = vsel %vm415_vm12, 1.0, %v1360_v6 }
 0x1da   :  { %v463_v43 = vmul.f32 %v1208_v16, %v1908_v59 }
 0x1dc   :  { %1104 = vst [vmem:[#allocation4 + $0x78] sm:$0xff] %v463_v43 }
 0x1dd   :  { %1132 = dma.vmem_to_hbm [thread:$0]  %s1125_s28, 2048, %s1127_s7, [#allocation5], %s1362_s5, %s1362_s5, %s1363_s25  }
 0x1de   :  { %1355 = dma.done.wait [#allocation3], 2048  }
 0x1df   :  { %1356 = vsyncadd [#allocation3], 4294965248 }
 0x1e0   :  { %1357 = dma.done.wait [#allocation5], 2048  }
 0x1e1   :  { %1358 = vsyncadd [#allocation5], 4294965248 }
 0x1e2   :  { %1143 = vsyncpa [#allocation3], 1 }
 0x1e3   :  { %1144 = vsyncpa [#allocation5], 1 }

</bundles_post_ra>
